<compile_context>
chip_gen: v6e
topology: v6e:2x2x1
jax: 0.10.0
libtpu: 0.0.40
codegen_flags: <defaults>
</compile_context>

<pallas_src>
import functools

import jax
import jax.numpy as jnp
from jax import lax
from jax.experimental import pallas as pl
from jax.experimental.pallas import tpu as pltpu

LANES = 128
STRIP_ROWS = 1024          # inner compute strip (bounds VMEM temporaries)
MAX_BLOCK_ROWS = 8192      # DMA block: 8192 x 128 f32 = 4 MiB per input


def _round_up(x, m):
    return ((x + m - 1) // m) * m


def _focal_partial_kernel(p_ref, t_ref, out_ref, *, alpha, gamma,
                          block_rows, strip_rows, total_rows,
                          mask_rows, hard_labels):
    num_strips = block_rows // strip_rows
    base_row = pl.program_id(0) * block_rows

    # Hoisted once (JAX does not CSE broadcast_in_dim inside loops).
    if mask_rows:
        row_iota = lax.broadcasted_iota(jnp.int32, (strip_rows, LANES), 0)

    def strip_body(s, acc):
        start = s * strip_rows
        if not isinstance(start, int):
            start = pl.multiple_of(start, strip_rows)

        # Load in native dtype, do math in f32 registers.
        p = p_ref[pl.ds(start, strip_rows), :].astype(jnp.float32)
        t = t_ref[pl.ds(start, strip_rows), :].astype(jnp.float32)

        if hard_labels:
            # Fast path (targets in {0,1}): 1 transcendental per element.
            pt = jnp.where(t >= 0.5, p, 1.0 - p)
            bce = -jnp.maximum(jnp.log(pt), -100.0)
        else:
            # Exact PyTorch binary_cross_entropy semantics (soft labels OK);
            # log terms clamped at -100 as in torch.
            log_p = jnp.maximum(jnp.log(p), -100.0)
            log_1mp = jnp.maximum(jnp.log(1.0 - p), -100.0)
            bce = -(t * log_p + (1.0 - t) * log_1mp)
            pt = jnp.exp(-bce)

        one_m_pt = 1.0 - pt
        # Specialize the modulating factor at trace time (gamma is Python).
        if gamma == 2.0:
            mod = one_m_pt * one_m_pt
        elif gamma == 1.0:
            mod = one_m_pt
        elif gamma == 0.0:
            mod = None
        else:
            mod = one_m_pt ** gamma

        f_loss = bce if mod is None else mod * bce
        if alpha != 1.0:
            f_loss = alpha * f_loss

        if mask_rows:
            # The last grid block extends past the array edge; those rows hold
            # undefined data, so zero their contribution (select, not multiply,
            # so NaN/Inf garbage cannot leak through).
            limit = total_rows - (base_row + start)
            f_loss = jnp.where(row_iota < limit, f_loss, 0.0)

        # VALU-only sublane-group fold onto a lane-dense (8, 128) tile
        # (no XLU cross-lane reduce, no serial SMEM scalar RMW).
        partial = jnp.sum(f_loss.reshape(strip_rows // 8, 8, LANES), axis=0)
        return acc + partial

    acc0 = jnp.zeros((8, LANES), jnp.float32)
    if num_strips == 1:
        out_ref[...] = strip_body(0, acc0)
    else:
        out_ref[...] = lax.fori_loop(0, num_strips, strip_body, acc0,
                                     unroll=True)


def focal_loss(inputs, targets, alpha=1.0, gamma=2.0, reduction="mean",
               hard_labels=False):
    """Focal loss on probabilities (matches the PyTorch FocalLoss.forward).

    hard_labels=True enables a 1-transcendental fast path that is only exact
    for targets in {0, 1}; the default path matches PyTorch for soft labels.
    """
    assert inputs.shape == targets.shape
    n = int(inputs.size)
    assert n > 0

    p_flat = jnp.ravel(inputs)
    t_flat = jnp.ravel(targets)

    # Sublane-packing row alignment: 8 (4-byte), 16 (2-byte), 32 (1-byte).
    itemsize = min(inputs.dtype.itemsize, targets.dtype.itemsize)
    row_align = max(8, 32 // max(int(itemsize), 1))

    rows = pl.cdiv(n, LANES)
    rows = _round_up(rows, row_align)
    n_padded = rows * LANES

    if n_padded != n:
        # TODO(synk): lane/sublane-unaligned sizes still pay one full-array
        # pad copy; a fully copy-free path would need 1-D edge-block handling.
        # Pad with p=1, t=1 (bce == 0, focal loss == 0) so these rows
        # contribute exactly nothing and need no in-kernel mask.
        pad = n_padded - n
        p_flat = jnp.pad(p_flat, (0, pad), constant_values=1)
        t_flat = jnp.pad(t_flat, (0, pad), constant_values=1)

    p2d = p_flat.reshape(rows, LANES)
    t2d = t_flat.reshape(rows, LANES)

    # Block / strip selection:
    #   * small inputs: one block covering the whole array, single strip.
    #   * larger inputs: >= 2 STRIP_ROWS-aligned blocks (feeds both
    #     TensorCores on v7x via the "parallel" grid axis), capped at
    #     MAX_BLOCK_ROWS so each step moves ~4 MiB per input and the fixed
    #     per-step cost is amortized; the last (partial) block is masked
    #     in-kernel instead of padding the whole array.
    if rows <= 2 * STRIP_ROWS:
        block_rows = rows
        strip_rows = rows
    else:
        block_rows = min(MAX_BLOCK_ROWS, _round_up(-(-rows // 2), STRIP_ROWS))
        strip_rows = STRIP_ROWS
    num_blocks = pl.cdiv(rows, block_rows)
    mask_rows = (rows % block_rows) != 0

    kernel = functools.partial(
        _focal_partial_kernel,
        alpha=float(alpha), gamma=float(gamma),
        block_rows=block_rows, strip_rows=strip_rows,
        total_rows=rows, mask_rows=mask_rows, hard_labels=bool(hard_labels))

    bytes_in = num_blocks * block_rows * LANES * (
        int(inputs.dtype.itemsize) + int(targets.dtype.itemsize))
    cost = pl.CostEstimate(
        flops=14 * n_padded,
        transcendentals=(1 if hard_labels else 3) * n_padded,
        bytes_accessed=bytes_in + num_blocks * 8 * LANES * 4)

    partials = pl.pallas_call(
        kernel,
        out_shape=jax.ShapeDtypeStruct((num_blocks * 8, LANES), jnp.float32),
        grid_spec=pltpu.PrefetchScalarGridSpec(
            num_scalar_prefetch=0,
            grid=(num_blocks,),
            in_specs=[
                pl.BlockSpec((block_rows, LANES), lambda i: (i, 0)),
                pl.BlockSpec((block_rows, LANES), lambda i: (i, 0)),
            ],
            out_specs=pl.BlockSpec((8, LANES), lambda i: (i, 0)),
        ),
        compiler_params=pltpu.CompilerParams(
            dimension_semantics=("parallel",),
            vmem_limit_bytes=32 * 1024 * 1024,
        ),
        cost_estimate=cost,
    )(p2d, t2d)

    total = jnp.sum(partials)

    if reduction == "mean":
        return total / jnp.float32(n)
    elif reduction == "sum":
        return total
    else:
        # TODO(synk): 'none' reduction (per-element map) is not produced by
        # this reduced-output kernel; only 'mean' and 'sum' are supported.
        raise NotImplementedError("only 'mean' and 'sum' reductions supported")


def _reference(p, t, alpha, gamma, reduction):
    """Pure-JAX mirror of the PyTorch module (f32 math)."""
    p = p.astype(jnp.float32)
    t = t.astype(jnp.float32)
    log_p = jnp.maximum(jnp.log(p), -100.0)
    log_1mp = jnp.maximum(jnp.log(1.0 - p), -100.0)
    bce = -(t * log_p + (1.0 - t) * log_1mp)
    pt = jnp.exp(-bce)
    f = alpha * (1.0 - pt) ** gamma * bce
    return jnp.mean(f) if reduction == "mean" else jnp.sum(f)


if __name__ == "__main__":
    key = jax.random.PRNGKey(0)
    k1, k2, k3, k4 = jax.random.split(key, 4)

    # Small shapes consistent with a segmentation/detection use: NCHW probs.
    x_shape = (2, 4, 16, 16)
    inputs = jax.nn.sigmoid(jax.random.normal(k1, x_shape, dtype=jnp.float32))
    targets = (jax.random.uniform(k2, x_shape) > 0.5).astype(jnp.float32)

    ok = True

    # 1) Default (soft-label-exact) path, mean reduction, f32.
    loss = jax.block_until_ready(
        focal_loss(inputs, targets, alpha=1.0, gamma=2.0, reduction="mean"))
    ref = _reference(inputs, targets, 1.0, 2.0, "mean")
    ok &= bool(jnp.allclose(loss, ref, rtol=1e-4, atol=1e-6))

    # 2) Hard-label fast path (1 transcendental / element), sum reduction.
    loss_h = jax.block_until_ready(
        focal_loss(inputs, targets, alpha=1.0, gamma=2.0, reduction="sum",
                   hard_labels=True))
    ref_h = _reference(inputs, targets, 1.0, 2.0, "sum")
    ok &= bool(jnp.allclose(loss_h, ref_h, rtol=1e-4, atol=1e-6))

    # 3) bf16 inputs (halved HBM traffic; in-register f32 math).
    inputs_bf = inputs.astype(jnp.bfloat16)
    targets_bf = targets.astype(jnp.bfloat16)
    loss_bf = jax.block_until_ready(
        focal_loss(inputs_bf, targets_bf, alpha=1.0, gamma=2.0,
                   reduction="mean"))
    ref_bf = _reference(inputs_bf, targets_bf, 1.0, 2.0, "mean")
    ok &= bool(jnp.allclose(loss_bf, ref_bf, rtol=1e-4, atol=1e-6))

    # 4) Larger input exercising the multi-block "parallel" grid, the inner
    #    strip loop, and the in-kernel edge-block masking (no pad copy).
    big_shape = (2, 4, 192, 192)   # 294912 elems -> rows=2304 -> 2 blocks
    big_in = jax.nn.sigmoid(jax.random.normal(k3, big_shape, jnp.float32))
    big_tg = (jax.random.uniform(k4, big_shape) > 0.5).astype(jnp.float32)
    loss_big = jax.block_until_ready(
        focal_loss(big_in, big_tg, alpha=0.25, gamma=2.0, reduction="mean"))
    ref_big = _reference(big_in, big_tg, 0.25, 2.0, "mean")
    ok &= bool(jnp.allclose(loss_big, ref_big, rtol=1e-4, atol=1e-6))

    assert ok, (loss, ref, loss_h, ref_h, loss_bf, ref_bf, loss_big, ref_big)
    print("KERNEL_OK")
</pallas_src>

<mosaic_0001>
module attributes {stable_mosaic.version = 11 : i64} {
  func.func @_focal_partial_kernel(%arg0: i32, %arg1: memref<16x128xf32, #tpu.memory_space<vmem>>, %arg2: memref<16x128xf32, #tpu.memory_space<vmem>>, %arg3: memref<8x128xf32, #tpu.memory_space<vmem>>) attributes {dimension_semantics = [#tpu.dimension_semantics<parallel>], iteration_bounds = array<i64: 1>, scalar_prefetch = 0 : i64, scratch_operands = 0 : i64, tpu.core_type = #tpu.core_type<tc>, window_params = [{transform_indices = @transform_0, window_bounds = array<i64: 16, 128>}, {transform_indices = @transform_1, window_bounds = array<i64: 16, 128>}, {transform_indices = @transform_2, window_bounds = array<i64: 8, 128>}]} {
    %cst = arith.constant 0.000000e+00 : f32
    %0 = vector.broadcast %cst : f32 to vector<8x128xf32>
    %c0 = arith.constant 0 : index
    %c0_0 = arith.constant 0 : index
    %1 = vector.load %arg1[%c0, %c0_0] : memref<16x128xf32, #tpu.memory_space<vmem>>, vector<16x128xf32>
    %c0_1 = arith.constant 0 : index
    %c0_2 = arith.constant 0 : index
    %2 = vector.load %arg2[%c0_1, %c0_2] : memref<16x128xf32, #tpu.memory_space<vmem>>, vector<16x128xf32>
    %3 = math.log %1 : vector<16x128xf32>
    %cst_3 = arith.constant -1.000000e+02 : f32
    %4 = vector.broadcast %cst_3 : f32 to vector<16x128xf32>
    %5 = arith.maximumf %3, %4 : vector<16x128xf32>
    %cst_4 = arith.constant 1.000000e+00 : f32
    %6 = vector.broadcast %cst_4 : f32 to vector<16x128xf32>
    %7 = arith.subf %6, %1 : vector<16x128xf32>
    %8 = math.log %7 : vector<16x128xf32>
    %cst_5 = arith.constant -1.000000e+02 : f32
    %9 = vector.broadcast %cst_5 : f32 to vector<16x128xf32>
    %10 = arith.maximumf %8, %9 : vector<16x128xf32>
    %11 = arith.mulf %2, %5 : vector<16x128xf32>
    %cst_6 = arith.constant 1.000000e+00 : f32
    %12 = vector.broadcast %cst_6 : f32 to vector<16x128xf32>
    %13 = arith.subf %12, %2 : vector<16x128xf32>
    %14 = arith.mulf %13, %10 : vector<16x128xf32>
    %15 = arith.addf %11, %14 : vector<16x128xf32>
    %cst_7 = arith.constant 0.000000e+00 : f32
    %16 = vector.broadcast %cst_7 : f32 to vector<16x128xf32>
    %17 = arith.subf %16, %15 : vector<16x128xf32>
    %cst_8 = arith.constant 0.000000e+00 : f32
    %18 = vector.broadcast %cst_8 : f32 to vector<16x128xf32>
    %19 = arith.subf %18, %17 : vector<16x128xf32>
    %20 = math.exp %19 : vector<16x128xf32>
    %cst_9 = arith.constant 1.000000e+00 : f32
    %21 = vector.broadcast %cst_9 : f32 to vector<16x128xf32>
    %22 = arith.subf %21, %20 : vector<16x128xf32>
    %23 = arith.mulf %22, %22 : vector<16x128xf32>
    %24 = arith.mulf %23, %17 : vector<16x128xf32>
    %25 = vector.shape_cast %24 : vector<16x128xf32> to vector<2x8x128xf32>
    %cst_10 = arith.constant dense<0.000000e+00> : vector<8x128xf32>
    %26 = vector.multi_reduction <add>, %25, %cst_10 [0] : vector<2x8x128xf32> to vector<8x128xf32>
    %27 = arith.addf %0, %26 : vector<8x128xf32>
    %c0_11 = arith.constant 0 : index
    %c0_12 = arith.constant 0 : index
    %28 = vector.load %arg3[%c0_11, %c0_12] : memref<8x128xf32, #tpu.memory_space<vmem>>, vector<8x128xf32>
    tpu.vector_store %arg3[%c0_11, %c0_12], %27 {strides = array<i32>} : memref<8x128xf32, #tpu.memory_space<vmem>>, vector<8x128xf32>,
    return
  }
  func.func @transform_0(%arg0: i32) -> (i32, i32) {
    %c0_i32 = arith.constant 0 : i32
    %c0_i32_0 = arith.constant 0 : i32
    return %arg0, %c0_i32 : i32, i32
  }
  func.func @transform_1(%arg0: i32) -> (i32, i32) {
    %c0_i32 = arith.constant 0 : i32
    %c0_i32_0 = arith.constant 0 : i32
    return %arg0, %c0_i32 : i32, i32
  }
  func.func @transform_2(%arg0: i32) -> (i32, i32) {
    %c0_i32 = arith.constant 0 : i32
    %c0_i32_0 = arith.constant 0 : i32
    return %arg0, %c0_i32 : i32, i32
  }
}

</mosaic_0001>

<bundles_post_ra>
// kernel: tpu_custom_call.1
= control target key start
LH: loop header
LB: loop body
LE: loop exit
PB: predicated region body
PF: predicated region fallthrough
CT: control target
= control target key end

     0   :  { %7 = vsyncpa [#allocation3], 0  ;;  %s211_s0 = inlined_call_operand.hbm [shape: f32[16,128], index: 0, kind: input, shape index: {}]   ;;  %s212_s1 = inlined_call_operand.hbm [shape: f32[16,128], index: 1, kind: input, shape index: {}]   ;;  %s213_s2 = inlined_call_operand.hbm [shape: f32[8,128], index: 2, kind: output, shape index: {}]  }
   0x1   :  { %8 = vsyncpa [#allocation6], 0 }
   0x2   :  { %9 = vsyncpa [#allocation4], 0  ;;  %s182_s9 = smov [#allocation2]  }
   0x3   :  { %s15_s10 = sshll.u32 %s182_s9, 4  ;;  %s16_s10 = int_to_ptr.vmem [resolvable:$true] %s15_s10 }
   0x4   :  { %s124_s11 = scalar_lea.vmem %s16_s10, 256  ;;  %p129_p1 = scmp.lt.s32.totalorder %s16_s10, %s16_s10 }
   0x5   :  { %p125_p0 = scmp.ne.s32.totalorder %s16_s10, %s124_s11  ;;  %p130_p2 = scmp.lt.s32.totalorder %s124_s11, %s124_s11 }
   0x7   :  { %p131_p3 = por %p130_p2, %p129_p1 }
   0x9   :  { %p132_p4 = pnand %p131_p3, %p125_p0 }
   0xb   :  { %135 = shalt.err (!%p132_p4)
}
   0xc   :  { %s183_s12 = smov 128   ;;  %s184_s13 = smov 8  }
   0xd   :  { %21 = dma.hbm_to_vmem [thread:$0]  %s211_s0, 256, %s16_s10, [#allocation3], %s183_s12, %s183_s12, %s184_s13  }
   0xe   :  { %s185_s16 = smov [#allocation5]  }
   0xf   :  { %s27_s17 = sshll.u32 %s185_s16, 4  ;;  %s28_s17 = int_to_ptr.vmem [resolvable:$true] %s27_s17 }
  0x10   :  { %s144_s18 = scalar_lea.vmem %s28_s17, 256  ;;  %p149_p6 = scmp.lt.s32.totalorder %s28_s17, %s28_s17 }
  0x11   :  { %p145_p5 = scmp.ne.s32.totalorder %s28_s17, %s144_s18  ;;  %p150_p7 = scmp.lt.s32.totalorder %s144_s18, %s144_s18 }
  0x13   :  { %p151_p8 = por %p150_p7, %p149_p6 }
  0x15   :  { %p152_p9 = pnand %p151_p8, %p145_p5 }
  0x17   :  { %155 = shalt.err (!%p152_p9)
}
  0x18   :  { %33 = dma.hbm_to_vmem [thread:$0]  %s212_s1, 256, %s28_s17, [#allocation6], %s183_s12, %s183_s12, %s184_s13  }
  0x19   :  { %176 = dma.done.wait [#allocation3], 256  }
  0x1a   :  { %177 = vsyncadd [#allocation3], 4294967040 }
  0x1b   :  { %178 = dma.done.wait [#allocation6], 256  }
  0x1c   :  { %179 = vsyncadd [#allocation6], 4294967040  ;;  %v40_v0 = vld [vmem:[#allocation2] sm:$0xff]  ;;  %v41_v1 = vld [vmem:[#allocation2 + $0x8] sm:$0xff]  ;;  %s186_s0 = smov [#allocation7]  }
  0x1d   :  { %104 = vlog2.f32 %v40_v0  ;;  %v50_v2 = vsub.f32 1.0, %v40_v0  ;;  %v51_v3 = vsub.f32 1.0, %v41_v1  ;;  %v42_v5 = vld [vmem:[#allocation5] sm:$0xff]  ;;  %v43_v7 = vld [vmem:[#allocation5 + $0x8] sm:$0xff]  ;;  %s89_s1 = sshll.u32 %s186_s0, 4  ;;  %s90_s1 = int_to_ptr.vmem [resolvable:$true] %s89_s1 }
  0x1e   :  { %106 = vlog2.f32 %v41_v1  ;;  %v60_v14 = vsub.f32 1.0, %v42_v5  ;;  %v61_v17 = vsub.f32 1.0, %v43_v7  ;;  %s156_s21 = scalar_lea.vmem %s90_s1, 128  ;;  %p161_p11 = scmp.lt.s32.totalorder %s90_s1, %s90_s1 }
  0x1f   :  { %108 = vlog2.f32 %v50_v2  ;;  %p157_p10 = scmp.ne.s32.totalorder %s90_s1, %s156_s21  ;;  %p162_p12 = scmp.lt.s32.totalorder %s156_s21, %s156_s21 }
  0x20   :  { %110 = vlog2.f32 %v51_v3 }
  0x21   :  { %p163_p13 = por %p162_p12, %p161_p11 }
  0x23   :  { %p164_p0 = pnand %p163_p13, %p157_p10 }
  0x2a   :  { %v105_v4 = vpop.eup %104 }
  0x2b   :  { %v107_v6 = vpop.eup %106  ;;  %v45_v8 = vmul.f32 0.6931472, %v105_v4 }
  0x2c   :  { %v109_v9 = vpop.eup %108  ;;  %v47_v10 = vmul.f32 0.6931472, %v107_v6 }
  0x2d   :  { %v111_v11 = vpop.eup %110  ;;  %v48_v12 = vmax.f32 %v45_v8, -100.0  ;;  %v53_v13 = vmul.f32 0.6931472, %v109_v9 }
  0x2e   :  { %v49_v15 = vmax.f32 %v47_v10, -100.0  ;;  %v55_v16 = vmul.f32 0.6931472, %v111_v11 }
  0x2f   :  { %v56_v18 = vmax.f32 %v53_v13, -100.0  ;;  %v58_v19 = vmul.f32 %v48_v12, %v42_v5 }
  0x30   :  { %v57_v20 = vmax.f32 %v55_v16, -100.0  ;;  %v59_v21 = vmul.f32 %v49_v15, %v43_v7 }
  0x31   :  { %v62_v22 = vmul.f32 %v60_v14, %v56_v18 }
  0x32   :  { %v63_v23 = vmul.f32 %v61_v17, %v57_v20 }
  0x33   :  { %v64_v24 = vadd.f32 %v62_v22, %v58_v19 }
  0x34   :  { %v65_v25 = vadd.f32 %v63_v23, %v59_v21 }
  0x35   :  { %v66_v26 = vsub.f32 0.0, %v64_v24 }
  0x36   :  { %v67_v27 = vsub.f32 0.0, %v65_v25 }
  0x37   :  { %v68_v28 = vsub.f32 0.0, %v66_v26 }
  0x38   :  { %v69_v29 = vsub.f32 0.0, %v67_v27 }
  0x39   :  { %v70_v30 = vmul.f32 1.442695, %v68_v28 }
  0x3a   :  { %v72_v31 = vmul.f32 1.442695, %v69_v29 }
  0x3b   :  { %112 = vpow2.f32 %v70_v30 }
  0x3c   :  { %114 = vpow2.f32 %v72_v31 }
  0x48   :  { %v113_v32 = vpop.eup %112 }
  0x49   :  { %v115_v33 = vpop.eup %114  ;;  %v74_v34 = vsub.f32 1.0, %v113_v32 }
  0x4a   :  { %v75_v35 = vsub.f32 1.0, %v115_v33 }
  0x4b   :  { %v76_v36 = vmul.f32 %v74_v34, %v74_v34 }
  0x4c   :  { %v77_v37 = vmul.f32 %v75_v35, %v75_v35 }
  0x4d   :  { %v78_v38 = vmul.f32 %v76_v36, %v66_v26 }
  0x4e   :  { %v79_v39 = vmul.f32 %v77_v37, %v67_v27 }
  0x50   :  { %v80_v40 = vadd.f32 %v79_v39, %v78_v38 }
  0x52   :  { %82 = vst [vmem:[#allocation7] sm:$0xff] %v80_v40 }
  0x53   :  { %167 = shalt.err (!%p164_p0)
}
  0x54   :  { %92 = dma.vmem_to_hbm [thread:$0]  %s90_s1, 128, %s213_s2, [#allocation4]  }
  0x55   :  { %180 = dma.done.wait [#allocation4], 128  }
  0x56   :  { %181 = vsyncadd [#allocation4], 4294967168 }
  0x57   :  { %96 = vsyncpa [#allocation3], 1 }
  0x58   :  { %97 = vsyncpa [#allocation6], 1 }
  0x59   :  { %98 = vsyncpa [#allocation4], 1 }

</bundles_post_ra>
